<compile_context>
chip_gen: v5e
topology: v5e:2x2
jax: 0.10.0
libtpu: 0.0.40
codegen_flags: <defaults>
</compile_context>

<pallas_src>
import math

import jax
import jax.numpy as jnp
import numpy as np
from jax.experimental import pallas as pl
from jax.experimental.pallas import tpu as pltpu


def _round_up(x, m):
    return ((x + m - 1) // m) * m


# ----------------------------------------------------------------------------
# Pallas kernel: fused pointwise conv (+ folded BN bias) + LeakyReLU per tile.
# ----------------------------------------------------------------------------
def _make_bpl_kernel(negative_slope, apply_act):
    def kernel(x_ref, w_ref, b_ref, o_ref):
        # x_ref: (TM, Cin) bf16   w_ref: (Cin, Cout) bf16
        # b_ref: (1, Cout)  f32   o_ref: (TM, Cout)  f32
        y = jnp.dot(x_ref[...], w_ref[...], preferred_element_type=jnp.float32)
        y = y + b_ref[...]
        if apply_act:
            y = jnp.where(y >= 0.0, y, negative_slope * y)   # LeakyReLU(0.2)
        o_ref[...] = y.astype(o_ref.dtype)

    return kernel


def basic_point_layer(x, conv_weight, bn_gamma=None, bn_beta=None,
                      bn_mean=None, bn_var=None, *, eps=1e-5,
                      negative_slope=0.2, is_out=False, tile_m=512):
    """x: (B, N, Cin) f32, conv_weight: (Cout, Cin) f32 -> (B, N, Cout) f32."""
    B, N, Cin = x.shape
    Cout = conv_weight.shape[0]

    # ---- fold BatchNorm (eval-mode running stats) into the conv ------------
    if is_out:
        w_eff = conv_weight.T                                    # (Cin, Cout)
        b_eff = jnp.zeros((1, Cout), jnp.float32)
    else:
        scale = bn_gamma * jax.lax.rsqrt(bn_var + eps)           # (Cout,)
        w_eff = (conv_weight * scale[:, None]).T                 # (Cin, Cout)
        b_eff = (bn_beta - bn_mean * scale).reshape(1, Cout).astype(jnp.float32)

    # ---- bf16 matmul operands, f32 accumulation -----------------------------
    w_bf = w_eff.astype(jnp.bfloat16)

    # ---- flatten (B, N) -> M rows; pad M to a multiple of the tile ----------
    M = B * N
    x2 = x.reshape(M, Cin).astype(jnp.bfloat16)
    tm = min(tile_m, _round_up(M, 8))          # keep sublane-aligned tiles
    m_pad = _round_up(M, tm)
    if m_pad != M:
        x2 = jnp.pad(x2, ((0, m_pad - M), (0, 0)))

    kernel = _make_bpl_kernel(negative_slope, not is_out)

    out = pl.pallas_call(
        kernel,
        out_shape=jax.ShapeDtypeStruct((m_pad, Cout), jnp.float32),
        grid=(m_pad // tm,),
        in_specs=[
            pl.BlockSpec((tm, Cin), lambda m: (m, 0)),     # x tile (streams)
            pl.BlockSpec((Cin, Cout), lambda m: (0, 0)),   # W_eff (VMEM-resident)
            pl.BlockSpec((1, Cout), lambda m: (0, 0)),     # b_eff (VMEM-resident)
        ],
        out_specs=pl.BlockSpec((tm, Cout), lambda m: (m, 0)),
        compiler_params=pltpu.CompilerParams(
            dimension_semantics=("parallel",)),
    )(x2, w_bf, b_eff)

    if m_pad != M:
        out = out[:M]
    return out.reshape(B, N, Cout)


# ----------------------------------------------------------------------------
# Pure-JAX references for correctness checks.
# ----------------------------------------------------------------------------
def reference_f32(x, w, gamma=None, beta=None, mean=None, var=None,
                  eps=1e-5, slope=0.2, is_out=False):
    """Exact eval-mode module math in f32 (conv -> BN -> LeakyReLU)."""
    y = jnp.einsum("bnc,oc->bno", x, w)
    if not is_out:
        y = (y - mean) * (gamma / jnp.sqrt(var + eps)) + beta
        y = jnp.where(y >= 0.0, y, slope * y)
    return y


def reference_mirror(x, w, gamma=None, beta=None, mean=None, var=None,
                     eps=1e-5, slope=0.2, is_out=False):
    """Mirrors the kernel's numeric contract: BN folded into W, bf16 matmul
    operands, f32 accumulation — used for a tight check of the Pallas path."""
    if is_out:
        w_eff = w.T
        b_eff = jnp.zeros((w.shape[0],), jnp.float32)
    else:
        scale = gamma / jnp.sqrt(var + eps)
        w_eff = (w * scale[:, None]).T
        b_eff = beta - mean * scale
    y = jnp.dot(x.astype(jnp.bfloat16), w_eff.astype(jnp.bfloat16),
                preferred_element_type=jnp.float32) + b_eff
    if not is_out:
        y = jnp.where(y >= 0.0, y, slope * y)
    return y


# ----------------------------------------------------------------------------
if __name__ == "__main__":
    B, N, Cin, Cout = 2, 512, 64, 128     # Cout multiple of 128 -> lane-dense stores

    key = jax.random.PRNGKey(0)
    kx, kw, kg, kb, km, kv, kw2 = jax.random.split(key, 7)

    x = jax.random.normal(kx, (B, N, Cin), jnp.float32)
    s = 1.0 / math.sqrt(Cin)
    w = jax.random.uniform(kw, (Cout, Cin), jnp.float32, -s, s)       # Conv1d weight
    gamma = jax.random.uniform(kg, (Cout,), jnp.float32, 0.5, 1.5)    # BN weight
    beta = 0.1 * jax.random.normal(kb, (Cout,), jnp.float32)          # BN bias
    mean = 0.1 * jax.random.normal(km, (Cout,), jnp.float32)          # BN running_mean
    var = jax.random.uniform(kv, (Cout,), jnp.float32, 0.5, 1.5)      # BN running_var

    # ---- standard path: conv -> BN -> LeakyReLU (-> dropout = identity) -----
    out = basic_point_layer(x, w, gamma, beta, mean, var)
    out = jax.block_until_ready(out)

    # tight check vs a reference with the same numeric contract (bf16 operands)
    ref_mirror = reference_mirror(x, w, gamma, beta, mean, var)
    np.testing.assert_allclose(np.asarray(out), np.asarray(ref_mirror),
                               rtol=5e-3, atol=5e-3)
    # loose check vs exact f32 module semantics (tolerance loosened for bf16)
    ref_f32 = reference_f32(x, w, gamma, beta, mean, var)
    np.testing.assert_allclose(np.asarray(out), np.asarray(ref_f32),
                               rtol=5e-2, atol=5e-2)

    # ---- is_out=True path: bare 1x1 conv, no BN / activation / dropout ------
    w2 = jax.random.uniform(kw2, (Cout, Cin), jnp.float32, -s, s)
    out2 = jax.block_until_ready(basic_point_layer(x, w2, is_out=True))
    ref2 = reference_mirror(x, w2, is_out=True)
    np.testing.assert_allclose(np.asarray(out2), np.asarray(ref2),
                               rtol=5e-3, atol=5e-3)

    # ---- odd N (exercise row-padding path) -----------------------------------
    x3 = jax.random.normal(kx, (B, 300, Cin), jnp.float32)
    out3 = jax.block_until_ready(basic_point_layer(x3, w, gamma, beta, mean, var))
    ref3 = reference_mirror(x3, w, gamma, beta, mean, var)
    np.testing.assert_allclose(np.asarray(out3), np.asarray(ref3),
                               rtol=5e-3, atol=5e-3)

    print("KERNEL_OK")
</pallas_src>

<mosaic_0001>
module attributes {stable_mosaic.version = 11 : i64} {
  func.func @kernel(%arg0: i32, %arg1: memref<512x64xbf16, #tpu.memory_space<vmem>>, %arg2: memref<64x128xbf16, #tpu.memory_space<vmem>>, %arg3: memref<1x128xf32, #tpu.memory_space<vmem>>, %arg4: memref<512x128xf32, #tpu.memory_space<vmem>>) attributes {dimension_semantics = [#tpu.dimension_semantics<parallel>], iteration_bounds = array<i64: 2>, scalar_prefetch = 0 : i64, scratch_operands = 0 : i64, tpu.core_type = #tpu.core_type<tc>, window_params = [{transform_indices = @transform_0, window_bounds = array<i64: 512, 64>}, {pipeline_mode = #tpu.pipeline_mode<synchronous>, transform_indices = @transform_1, window_bounds = array<i64: 64, 128>}, {pipeline_mode = #tpu.pipeline_mode<synchronous>, transform_indices = @transform_2, window_bounds = array<i64: 1, 128>}, {transform_indices = @transform_3, window_bounds = array<i64: 512, 128>}]} {
    %c0 = arith.constant 0 : index
    %c0_0 = arith.constant 0 : index
    %0 = vector.load %arg1[%c0, %c0_0] : memref<512x64xbf16, #tpu.memory_space<vmem>>, vector<512x64xbf16>
    %c0_1 = arith.constant 0 : index
    %c0_2 = arith.constant 0 : index
    %1 = vector.load %arg2[%c0_1, %c0_2] : memref<64x128xbf16, #tpu.memory_space<vmem>>, vector<64x128xbf16>
    %cst = arith.constant dense<0.000000e+00> : vector<512x128xf32>
    %2 = tpu.matmul %0, %1, %cst {dimension_numbers = #tpu.dot_dimension_numbers<[1], [0], [0], [1], [0, 0, 1, 1], [], []>} : vector<512x64xbf16>, vector<64x128xbf16>, vector<512x128xf32> -> vector<512x128xf32>
    %c0_3 = arith.constant 0 : index
    %c0_4 = arith.constant 0 : index
    %3 = vector.load %arg3[%c0_3, %c0_4] : memref<1x128xf32, #tpu.memory_space<vmem>>, vector<1x128xf32>
    %4 = vector.broadcast %3 : vector<1x128xf32> to vector<512x128xf32>
    %5 = arith.addf %2, %4 : vector<512x128xf32>
    %cst_5 = arith.constant 0.000000e+00 : f32
    %6 = vector.broadcast %cst_5 : f32 to vector<512x128xf32>
    %7 = arith.cmpf oge, %5, %6 : vector<512x128xf32>
    %cst_6 = arith.constant 2.000000e-01 : f32
    %8 = vector.broadcast %cst_6 : f32 to vector<512x128xf32>
    %9 = arith.mulf %8, %5 : vector<512x128xf32>
    %10 = arith.select %7, %5, %9 : vector<512x128xi1>, vector<512x128xf32>
    %c0_7 = arith.constant 0 : index
    %c0_8 = arith.constant 0 : index
    %11 = vector.load %arg4[%c0_7, %c0_8] : memref<512x128xf32, #tpu.memory_space<vmem>>, vector<512x128xf32>
    tpu.vector_store %arg4[%c0_7, %c0_8], %10 {strides = array<i32>} : memref<512x128xf32, #tpu.memory_space<vmem>>, vector<512x128xf32>,
    return
  }
  func.func @transform_0(%arg0: i32) -> (i32, i32) {
    %c0_i32 = arith.constant 0 : i32
    %c0_i32_0 = arith.constant 0 : i32
    return %arg0, %c0_i32 : i32, i32
  }
  func.func @transform_1(%arg0: i32) -> (i32, i32) {
    %c0_i32 = arith.constant 0 : i32
    %c0_i32_0 = arith.constant 0 : i32
    %c0_i32_1 = arith.constant 0 : i32
    return %c0_i32, %c0_i32_0 : i32, i32
  }
  func.func @transform_2(%arg0: i32) -> (i32, i32) {
    %c0_i32 = arith.constant 0 : i32
    %c0_i32_0 = arith.constant 0 : i32
    %c0_i32_1 = arith.constant 0 : i32
    return %c0_i32, %c0_i32_0 : i32, i32
  }
  func.func @transform_3(%arg0: i32) -> (i32, i32) {
    %c0_i32 = arith.constant 0 : i32
    %c0_i32_0 = arith.constant 0 : i32
    return %arg0, %c0_i32 : i32, i32
  }
}

</mosaic_0001>

<bundles_post_ra>
// kernel: tpu_custom_call.1
= control target key start
LH: loop header
LB: loop body
LE: loop exit
PB: predicated region body
PF: predicated region fallthrough
CT: control target
= control target key end

     0   :  { %8 = vsyncpa [#allocation3], 0  ;;  %s1700_s0 = inlined_call_operand.vmem [shape: bf16[1024,64], index: 0, kind: input, shape index: {}]   ;;  %s1701_s1 = inlined_call_operand.vmem [shape: bf16[64,128], index: 1, kind: input, shape index: {}]   ;;  %s1702_s2 = inlined_call_operand.vmem [shape: f32[1,128], index: 2, kind: input, shape index: {}]   ;;  %s1703_s3 = inlined_call_operand.hbm [shape: f32[1024,128], index: 3, kind: output, shape index: {}]  }
   0x1   :  { %10 = vsyncpa [#allocation3 + $0x1], 0  ;;  %s1398_s12 = smov 0   ;;  %s1400_s13 = smov 0  }
   0x2   :  { %s1402_s14 = smov 0   ;;  %s1404_s15 = smov 0  }
   0x3 LB: > { %s1419_s16 = sadd.s32 4294967295, %s1374_s15   ;;  %s1033_s17 = sadd.s32 4294967294, %s1374_s15   ;;  %s1374_s15 = sphi %s1404_s15, %s1709_s15   ;;  %s1370_s14 = sphi %s1402_s14, %s1708_s14   ;;  %s1366_s13 = sphi %s1400_s13, %s1707_s13   ;;  %s1362_s12 = sphi %s1398_s12, %s1706_s12  }
   0x4   : > { %s1423_s18 = sadd.s32 1, %s1374_s15   ;;  %s91_s19 = sadd.s32 1, %s1370_s14 }
   0x5   : > { %s88_s20 = ssub.s32 %s1374_s15, %s1423_s18  ;;  %p101_p0 = scmp.ne.s32.totalorder %s1370_s14, %s1366_s13 }
   0x6   : > { %p89_p1 = scmp.eq.s32.totalorder %s88_s20, 0  ;;  %p102_p2 = scmp.eq.s32.totalorder %s1419_s16, 1 }
   0x7   : > { %p107_p3 = scmp.ne.s32.totalorder %s1366_s13, %s1362_s12  ;;  %p108_p4 = scmp.eq.s32.totalorder %s1033_s17, 1 }
   0x8   : > { %s1434_s21 = scalar_select %p89_p1, %s1370_s14, %s91_s19  }
   0x9   : > { %p1436_p5 = por %p102_p2, %p101_p0  ;;  %p1440_p6 = por %p108_p4, %p107_p3 }
   0xa   : > { %p1036_p7 = scmp.ge.s32.totalorder %s1374_s15, 1  ;;  %p141_p8 = scmp.lt.s32.totalorder %s1374_s15, 3 }
   0xc   : > { %p142_p9 = pnand %p1036_p7, %p141_p8 }
   0xd   : > { %s1038_s26 = sshll.u32 (!%p142_p9), %s1419_s16, 6  ;;  %s162_s10 = sand.u32 (!%p142_p9), 1, %s1366_s13  }
   0xe   : > { %145 = sbr.rel (%p142_p9) target bundleno = 298 (0x12a), region = 32  ;;  %p166_p10 = scmp.lt.s32.totalorder (!%p142_p9), %s1038_s26, 127 }
   0xf   : > { %s1037_s19 = sshll.u32 (!%p142_p9), %s162_s10, 9  ;;  %s1257_s24 = sshll.u32 (!%p142_p9), %s1419_s16, 9 }
  0x10   : > { %s1538_s20 = scalar_lea.vmem (!%p142_p9), [#allocation2], %s1037_s19  ;;  %s967_s16 = scalar_lea.hbm (!%p142_p9), %s1703_s3, %s1257_s24 }
  0x11   : > { %s968_s27 = sshll.u32 (!%p142_p9), %s1538_s20, 4  ;;  %s970_s28 = sshll.u32 (!%p142_p9), %s967_s16, 4  ;;  %s969_s27 = int_to_ptr.vmem [resolvable:$true] %s968_s27  ;;  %s971_s28 = int_to_ptr.hbm [resolvable:$true] %s970_s28 }
  0x12   : > { %s956_s29 = scalar_lea.sflag (!%p142_p9), [#allocation3], %s162_s10  ;;  %s1326_s30 = sshra.s32 (!%p142_p9), %s971_s28, 4  ;;  %s1327_s30 = int_to_ptr.hbm [resolvable:$true] %s1326_s30 }
  0x13   : > { %v1256_v0 = vld [vmem:[%s1701_s1 + $0x18] sm:$0xff]  ;;  %v1255_v1 = vld [vmem:[%s1701_s1 + $0x10] sm:$0xff]  ;;  %s1711_s26 = smov (!%p166_p10, %s1038_s26), 127  ;;  %v1254_v2 = vld [vmem:[%s1701_s1 + $0x8] sm:$0xff]  ;;  %vm433_vm0 = vcmask 523264   ;;  %s1332_s7 = scalar_lea.hbm %s1703_s3, 1024 }
  0x14   : > { %534 = vmatpush.bf16.msra.mxu0 %v1256_v0  ;;  %1258 = vmatpush.bf16.msra.mxu1 %v1256_v0  ;;  %s1039_s4 = sshll.u32 %s1711_s26, 2  ;;  %v1253_v3 = vld [vmem:[%s1701_s1] sm:$0xff]  ;;  %p1333_p0 = scmp.lt.s32.totalorder %s1327_s30, %s1703_s3 }
  0x15   : > { %1259 = vmatpush.bf16.msra.mxu2 %v1256_v0  ;;  %1260 = vmatpush.bf16.msra.mxu3 %v1256_v0  ;;  %s1462_s9 = scalar_lea.vmem %s1700_s0, %s1039_s4  ;;  %v1532_v36 = vld [vmem:[%s1702_s2] ss:$0 sm:$0xff]  ;;  %s1328_s4 = scalar_lea.hbm %s1327_s30, 512 }
  0x16   : > { %v1221_v4 = vld [vmem:[%s1462_s9] sm:$0xff]  ;;  %v1222_v8 = vld [vmem:[%s1462_s9 + $0x8] sm:$0xff]  ;;  %v1223_v12 = vld [vmem:[%s1462_s9 + $0x10] sm:$0xff]  ;;  %p1329_p11 = scmp.ne.s32.totalorder %s1327_s30, %s1328_s4  ;;  %p1334_p1 = scmp.lt.s32.totalorder %s1332_s7, %s1328_s4 }
  0x17   : > { %v1229_v5 = vld [vmem:[%s1462_s9 + $0x40] sm:$0xff]  ;;  %v1230_v9 = vld [vmem:[%s1462_s9 + $0x48] sm:$0xff]  ;;  %v1231_v13 = vld [vmem:[%s1462_s9 + $0x50] sm:$0xff] }
  0x18   : > { %535 = vmatpush.bf16.msra.mxu0 %v1255_v1  ;;  %1261 = vmatpush.bf16.msra.mxu1 %v1255_v1  ;;  %v1237_v6 = vld [vmem:[%s1462_s9 + $0x80] sm:$0xff]  ;;  %v1238_v10 = vld [vmem:[%s1462_s9 + $0x88] sm:$0xff]  ;;  %v1239_v14 = vld [vmem:[%s1462_s9 + $0x90] sm:$0xff]  ;;  %p1330_p12 = pnand %p1329_p11, %p1436_p5  ;;  %p1335_p2 = por %p1334_p1, %p1333_p0 }
  0x19   : > { %1262 = vmatpush.bf16.msra.mxu2 %v1255_v1  ;;  %1263 = vmatpush.bf16.msra.mxu3 %v1255_v1  ;;  %v1245_v7 = vld [vmem:[%s1462_s9 + $0xc0] sm:$0xff]  ;;  %v1246_v11 = vld [vmem:[%s1462_s9 + $0xc8] sm:$0xff]  ;;  %v1247_v15 = vld [vmem:[%s1462_s9 + $0xd0] sm:$0xff] }
  0x1a   : > { %v1224_v16 = vld [vmem:[%s1462_s9 + $0x18] sm:$0xff]  ;;  %v1225_v20 = vld [vmem:[%s1462_s9 + $0x20] sm:$0xff]  ;;  %v1226_v24 = vld [vmem:[%s1462_s9 + $0x28] sm:$0xff]  ;;  %p1331_p13 = pneg %p1330_p12 }
  0x1b   : > { %v1232_v17 = vld [vmem:[%s1462_s9 + $0x58] sm:$0xff]  ;;  %v1233_v21 = vld [vmem:[%s1462_s9 + $0x60] sm:$0xff]  ;;  %v1234_v25 = vld [vmem:[%s1462_s9 + $0x68] sm:$0xff] }
  0x1c   : > { %536 = vmatpush.bf16.msra.mxu0 %v1254_v2  ;;  %1264 = vmatpush.bf16.msra.mxu1 %v1254_v2  ;;  %v1240_v18 = vld [vmem:[%s1462_s9 + $0x98] sm:$0xff]  ;;  %v1241_v22 = vld [vmem:[%s1462_s9 + $0xa0] sm:$0xff]  ;;  %v1242_v26 = vld [vmem:[%s1462_s9 + $0xa8] sm:$0xff]  ;;  %p1336_p3 = pnand %p1335_p2, %p1331_p13 }
  0x1d   : > { %1265 = vmatpush.bf16.msra.mxu2 %v1254_v2  ;;  %1266 = vmatpush.bf16.msra.mxu3 %v1254_v2  ;;  %v1248_v19 = vld [vmem:[%s1462_s9 + $0xd8] sm:$0xff]  ;;  %v1249_v23 = vld [vmem:[%s1462_s9 + $0xe0] sm:$0xff]  ;;  %v1250_v27 = vld [vmem:[%s1462_s9 + $0xe8] sm:$0xff] }
  0x1e   : > { %v1227_v28 = vld [vmem:[%s1462_s9 + $0x30] sm:$0xff]  ;;  %v1228_v32 = vld [vmem:[%s1462_s9 + $0x38] sm:$0xff] }
  0x1f   : > { %v1235_v29 = vld [vmem:[%s1462_s9 + $0x70] sm:$0xff]  ;;  %v1236_v33 = vld [vmem:[%s1462_s9 + $0x78] sm:$0xff] }
  0x20   : > { %537 = vmatpush.bf16.msra.mxu0 %v1253_v3  ;;  %1267 = vmatpush.bf16.msra.mxu1 %v1253_v3  ;;  %v1243_v30 = vld [vmem:[%s1462_s9 + $0xb0] sm:$0xff]  ;;  %v1244_v34 = vld [vmem:[%s1462_s9 + $0xb8] sm:$0xff] }
  0x21   : > { %1268 = vmatpush.bf16.msra.mxu2 %v1253_v3  ;;  %1269 = vmatpush.bf16.msra.mxu3 %v1253_v3  ;;  %v1251_v31 = vld [vmem:[%s1462_s9 + $0xf0] sm:$0xff]  ;;  %v1252_v35 = vld [vmem:[%s1462_s9 + $0xf8] sm:$0xff] }
  0x23   : > { %1184 = vmatmul.msk.bf16.vlgmr.msra.gmra.mxu0 %vm433_vm0, %v1221_v4  ;;  %1192 = vmatmul.msk.bf16.vlgmr.msra.gmra.mxu1 %vm433_vm0, %v1229_v5 }
  0x24   : > { %1200 = vmatmul.msk.bf16.vlgmr.msra.gmra.mxu2 %vm433_vm0, %v1237_v6  ;;  %1208 = vmatmul.msk.bf16.vlgmr.msra.gmra.mxu3 %vm433_vm0, %v1245_v7 }
  0x33   : > { %1185 = vmatmul.msk.bf16.gmra.mxu0 %vm433_vm0, %v1222_v8  ;;  %1193 = vmatmul.msk.bf16.gmra.mxu1 %vm433_vm0, %v1230_v9 }
  0x34   : > { %1201 = vmatmul.msk.bf16.gmra.mxu2 %vm433_vm0, %v1238_v10  ;;  %1209 = vmatmul.msk.bf16.gmra.mxu3 %vm433_vm0, %v1246_v11 }
  0x43   : > { %1186 = vmatmul.msk.bf16.gmra.mxu0 %vm433_vm0, %v1223_v12  ;;  %1194 = vmatmul.msk.bf16.gmra.mxu1 %vm433_vm0, %v1231_v13 }
  0x44   : > { %1202 = vmatmul.msk.bf16.gmra.mxu2 %vm433_vm0, %v1239_v14  ;;  %1210 = vmatmul.msk.bf16.gmra.mxu3 %vm433_vm0, %v1247_v15 }
  0x53   : > { %1187 = vmatmul.msk.bf16.gmra.mxu0 %vm433_vm0, %v1224_v16  ;;  %1195 = vmatmul.msk.bf16.gmra.mxu1 %vm433_vm0, %v1232_v17 }
  0x54   : > { %1203 = vmatmul.msk.bf16.gmra.mxu2 %vm433_vm0, %v1240_v18  ;;  %1211 = vmatmul.msk.bf16.gmra.mxu3 %vm433_vm0, %v1248_v19 }
  0x63   : > { %1188 = vmatmul.msk.bf16.gmra.mxu0 %vm433_vm0, %v1225_v20  ;;  %1196 = vmatmul.msk.bf16.gmra.mxu1 %vm433_vm0, %v1233_v21 }
  0x64   : > { %1204 = vmatmul.msk.bf16.gmra.mxu2 %vm433_vm0, %v1241_v22  ;;  %1212 = vmatmul.msk.bf16.gmra.mxu3 %vm433_vm0, %v1249_v23 }
  0x73   : > { %1189 = vmatmul.msk.bf16.gmra.mxu0 %vm433_vm0, %v1226_v24  ;;  %1197 = vmatmul.msk.bf16.gmra.mxu1 %vm433_vm0, %v1234_v25 }
  0x74   : > { %1205 = vmatmul.msk.bf16.gmra.mxu2 %vm433_vm0, %v1242_v26  ;;  %1213 = vmatmul.msk.bf16.gmra.mxu3 %vm433_vm0, %v1250_v27 }
  0x83   : > { %1190 = vmatmul.msk.bf16.gmra.mxu0 %vm433_vm0, %v1227_v28  ;;  %1198 = vmatmul.msk.bf16.gmra.mxu1 %vm433_vm0, %v1235_v29 }
  0x84   : > { %1206 = vmatmul.msk.bf16.gmra.mxu2 %vm433_vm0, %v1243_v30  ;;  %1214 = vmatmul.msk.bf16.gmra.mxu3 %vm433_vm0, %v1251_v31 }
  0x93   : > { %1191 = vmatmul.msk.bf16.gmra.mxu0 %vm433_vm0, %v1228_v32  ;;  %1199 = vmatmul.msk.bf16.gmra.mxu1 %vm433_vm0, %v1236_v33 }
  0x94   : > { %1207 = vmatmul.msk.bf16.gmra.mxu2 %vm433_vm0, %v1244_v34  ;;  %1215 = vmatmul.msk.bf16.gmra.mxu3 %vm433_vm0, %v1252_v35 }
  0xa0   : > { %v539_v37 = vpop.f32.mrf.mxu0  ;;  %v579_v38 = vpop.f32.mrf.mxu1 }
  0xa1   : > { %v540_v39 = vadd.f32 %v1532_v36, %v539_v37  ;;  %v580_v40 = vadd.f32 %v1532_v36, %v579_v38 }
  0xa3   : > { %vm699_vm1 = vcmp.ge.f32.partialorder %v540_v39, 0.0  ;;  %v763_v41 = vmul.f32 0.2, %v540_v39  ;;  %vm715_vm2 = vcmp.ge.f32.partialorder %v580_v40, 0.0  ;;  %v779_v42 = vmul.f32 0.2, %v580_v40 }
  0xa5   : > { %v827_v43 = vsel %vm699_vm1, %v540_v39, %v763_v41  ;;  %v843_v44 = vsel %vm715_vm2, %v580_v40, %v779_v42 }
  0xa6   : > { %891 = vst [vmem:[%s1538_s20] sm:$0xff] %v827_v43 }
  0xa7   : > { %907 = vst [vmem:[%s1538_s20 + $0x80] sm:$0xff] %v843_v44  ;;  %v619_v45 = vpop.f32.mrf.mxu2  ;;  %v659_v46 = vpop.f32.mrf.mxu3 }
  0xa8   : > { %v620_v47 = vadd.f32 %v1532_v36, %v619_v45  ;;  %v660_v48 = vadd.f32 %v1532_v36, %v659_v46  ;;  %v541_v49 = vpop.f32.mrf.mxu0  ;;  %v581_v50 = vpop.f32.mrf.mxu1 }
  0xa9   : > { %v542_v51 = vadd.f32 %v1532_v36, %v541_v49  ;;  %v582_v52 = vadd.f32 %v1532_v36, %v581_v50 }
  0xaa   : > { %vm731_vm3 = vcmp.ge.f32.partialorder %v620_v47, 0.0  ;;  %v795_v53 = vmul.f32 0.2, %v620_v47  ;;  %vm747_vm4 = vcmp.ge.f32.partialorder %v660_v48, 0.0  ;;  %v811_v54 = vmul.f32 0.2, %v660_v48 }
  0xab   : > { %vm700_vm5 = vcmp.ge.f32.partialorder %v542_v51, 0.0  ;;  %v764_v55 = vmul.f32 0.2, %v542_v51  ;;  %vm716_vm6 = vcmp.ge.f32.partialorder %v582_v52, 0.0  ;;  %v780_v56 = vmul.f32 0.2, %v582_v52 }
  0xac   : > { %v859_v57 = vsel %vm731_vm3, %v620_v47, %v795_v53  ;;  %v875_v58 = vsel %vm747_vm4, %v660_v48, %v811_v54 }
  0xad   : > { %923 = vst [vmem:[%s1538_s20 + $0x100] sm:$0xff] %v859_v57  ;;  %v828_v59 = vsel %vm700_vm5, %v542_v51, %v764_v55  ;;  %v844_v60 = vsel %vm716_vm6, %v582_v52, %v780_v56 }
  0xae   : > { %939 = vst [vmem:[%s1538_s20 + $0x180] sm:$0xff] %v875_v58 }
  0xaf   : > { %892 = vst [vmem:[%s1538_s20 + $0x8] sm:$0xff] %v828_v59  ;;  %v621_v61 = vpop.f32.mrf.mxu2  ;;  %v661_v62 = vpop.f32.mrf.mxu3 }
  0xb0   : > { %908 = vst [vmem:[%s1538_s20 + $0x88] sm:$0xff] %v844_v60  ;;  %v622_v63 = vadd.f32 %v1532_v36, %v621_v61  ;;  %v662_v0 = vadd.f32 %v1532_v36, %v661_v62  ;;  %v544_v1 = vpop.f32.mrf.mxu0  ;;  %v584_v2 = vpop.f32.mrf.mxu1 }
  0xb1   : > { %v545_v3 = vadd.f32 %v1532_v36, %v544_v1  ;;  %v585_v4 = vadd.f32 %v1532_v36, %v584_v2 }
  0xb2   : > { %vm732_vm7 = vcmp.ge.f32.partialorder %v622_v63, 0.0  ;;  %v796_v5 = vmul.f32 0.2, %v622_v63  ;;  %vm748_vm8 = vcmp.ge.f32.partialorder %v662_v0, 0.0  ;;  %v812_v6 = vmul.f32 0.2, %v662_v0 }
  0xb3   : > { %vm701_vm9 = vcmp.ge.f32.partialorder %v545_v3, 0.0  ;;  %v765_v7 = vmul.f32 0.2, %v545_v3  ;;  %vm717_vm10 = vcmp.ge.f32.partialorder %v585_v4, 0.0  ;;  %v781_v8 = vmul.f32 0.2, %v585_v4 }
  0xb4   : > { %v860_v9 = vsel %vm732_vm7, %v622_v63, %v796_v5  ;;  %v876_v10 = vsel %vm748_vm8, %v662_v0, %v812_v6 }
  0xb5   : > { %924 = vst [vmem:[%s1538_s20 + $0x108] sm:$0xff] %v860_v9  ;;  %v829_v11 = vsel %vm701_vm9, %v545_v3, %v765_v7  ;;  %v845_v12 = vsel %vm717_vm10, %v585_v4, %v781_v8 }
  0xb6   : > { %940 = vst [vmem:[%s1538_s20 + $0x188] sm:$0xff] %v876_v10 }
  0xb7   : > { %893 = vst [vmem:[%s1538_s20 + $0x10] sm:$0xff] %v829_v11  ;;  %v624_v13 = vpop.f32.mrf.mxu2  ;;  %v664_v14 = vpop.f32.mrf.mxu3 }
  0xb8   : > { %909 = vst [vmem:[%s1538_s20 + $0x90] sm:$0xff] %v845_v12  ;;  %v625_v15 = vadd.f32 %v1532_v36, %v624_v13  ;;  %v665_v16 = vadd.f32 %v1532_v36, %v664_v14  ;;  %v546_v17 = vpop.f32.mrf.mxu0  ;;  %v586_v18 = vpop.f32.mrf.mxu1 }
  0xb9   : > { %v547_v19 = vadd.f32 %v1532_v36, %v546_v17  ;;  %v587_v20 = vadd.f32 %v1532_v36, %v586_v18 }
  0xba   : > { %vm733_vm11 = vcmp.ge.f32.partialorder %v625_v15, 0.0  ;;  %v797_v21 = vmul.f32 0.2, %v625_v15  ;;  %vm749_vm12 = vcmp.ge.f32.partialorder %v665_v16, 0.0  ;;  %v813_v22 = vmul.f32 0.2, %v665_v16 }
  0xbb   : > { %vm702_vm13 = vcmp.ge.f32.partialorder %v547_v19, 0.0  ;;  %v766_v23 = vmul.f32 0.2, %v547_v19  ;;  %vm718_vm14 = vcmp.ge.f32.partialorder %v587_v20, 0.0  ;;  %v782_v24 = vmul.f32 0.2, %v587_v20 }
  0xbc   : > { %v861_v25 = vsel %vm733_vm11, %v625_v15, %v797_v21  ;;  %v877_v26 = vsel %vm749_vm12, %v665_v16, %v813_v22 }
  0xbd   : > { %925 = vst [vmem:[%s1538_s20 + $0x110] sm:$0xff] %v861_v25  ;;  %v830_v27 = vsel %vm702_vm13, %v547_v19, %v766_v23  ;;  %v846_v28 = vsel %vm718_vm14, %v587_v20, %v782_v24 }
  0xbe   : > { %941 = vst [vmem:[%s1538_s20 + $0x190] sm:$0xff] %v877_v26 }
  0xbf   : > { %894 = vst [vmem:[%s1538_s20 + $0x18] sm:$0xff] %v830_v27  ;;  %v626_v29 = vpop.f32.mrf.mxu2  ;;  %v666_v30 = vpop.f32.mrf.mxu3 }
  0xc0   : > { %910 = vst [vmem:[%s1538_s20 + $0x98] sm:$0xff] %v846_v28  ;;  %v627_v31 = vadd.f32 %v1532_v36, %v626_v29  ;;  %v667_v32 = vadd.f32 %v1532_v36, %v666_v30  ;;  %v549_v33 = vpop.f32.mrf.mxu0  ;;  %v589_v34 = vpop.f32.mrf.mxu1 }
  0xc1   : > { %v550_v35 = vadd.f32 %v1532_v36, %v549_v33  ;;  %v590_v37 = vadd.f32 %v1532_v36, %v589_v34 }
  0xc2   : > { %vm734_vm15 = vcmp.ge.f32.partialorder %v627_v31, 0.0  ;;  %v798_v38 = vmul.f32 0.2, %v627_v31  ;;  %vm750_vm0 = vcmp.ge.f32.partialorder %v667_v32, 0.0  ;;  %v814_v39 = vmul.f32 0.2, %v667_v32 }
  0xc3   : > { %vm703_vm1 = vcmp.ge.f32.partialorder %v550_v35, 0.0  ;;  %v767_v40 = vmul.f32 0.2, %v550_v35  ;;  %vm719_vm2 = vcmp.ge.f32.partialorder %v590_v37, 0.0  ;;  %v783_v41 = vmul.f32 0.2, %v590_v37 }
  0xc4   : > { %v862_v42 = vsel %vm734_vm15, %v627_v31, %v798_v38  ;;  %v878_v43 = vsel %vm750_vm0, %v667_v32, %v814_v39 }
  0xc5   : > { %926 = vst [vmem:[%s1538_s20 + $0x118] sm:$0xff] %v862_v42  ;;  %v831_v44 = vsel %vm703_vm1, %v550_v35, %v767_v40  ;;  %v847_v45 = vsel %vm719_vm2, %v590_v37, %v783_v41 }
  0xc6   : > { %942 = vst [vmem:[%s1538_s20 + $0x198] sm:$0xff] %v878_v43 }
  0xc7   : > { %895 = vst [vmem:[%s1538_s20 + $0x20] sm:$0xff] %v831_v44  ;;  %v629_v46 = vpop.f32.mrf.mxu2  ;;  %v669_v47 = vpop.f32.mrf.mxu3 }
  0xc8   : > { %911 = vst [vmem:[%s1538_s20 + $0xa0] sm:$0xff] %v847_v45  ;;  %v630_v48 = vadd.f32 %v1532_v36, %v629_v46  ;;  %v670_v49 = vadd.f32 %v1532_v36, %v669_v47  ;;  %v551_v50 = vpop.f32.mrf.mxu0  ;;  %v591_v51 = vpop.f32.mrf.mxu1 }
  0xc9   : > { %v552_v52 = vadd.f32 %v1532_v36, %v551_v50  ;;  %v592_v53 = vadd.f32 %v1532_v36, %v591_v51 }
  0xca   : > { %vm735_vm3 = vcmp.ge.f32.partialorder %v630_v48, 0.0  ;;  %v799_v54 = vmul.f32 0.2, %v630_v48  ;;  %vm751_vm4 = vcmp.ge.f32.partialorder %v670_v49, 0.0  ;;  %v815_v55 = vmul.f32 0.2, %v670_v49 }
  0xcb   : > { %vm704_vm5 = vcmp.ge.f32.partialorder %v552_v52, 0.0  ;;  %v768_v56 = vmul.f32 0.2, %v552_v52  ;;  %vm720_vm6 = vcmp.ge.f32.partialorder %v592_v53, 0.0  ;;  %v784_v57 = vmul.f32 0.2, %v592_v53 }
  0xcc   : > { %v863_v58 = vsel %vm735_vm3, %v630_v48, %v799_v54  ;;  %v879_v59 = vsel %vm751_vm4, %v670_v49, %v815_v55 }
  0xcd   : > { %927 = vst [vmem:[%s1538_s20 + $0x120] sm:$0xff] %v863_v58  ;;  %v832_v60 = vsel %vm704_vm5, %v552_v52, %v768_v56  ;;  %v848_v61 = vsel %vm720_vm6, %v592_v53, %v784_v57 }
  0xce   : > { %943 = vst [vmem:[%s1538_s20 + $0x1a0] sm:$0xff] %v879_v59 }
  0xcf   : > { %896 = vst [vmem:[%s1538_s20 + $0x28] sm:$0xff] %v832_v60  ;;  %v631_v62 = vpop.f32.mrf.mxu2  ;;  %v671_v63 = vpop.f32.mrf.mxu3 }
  0xd0   : > { %912 = vst [vmem:[%s1538_s20 + $0xa8] sm:$0xff] %v848_v61  ;;  %v632_v0 = vadd.f32 %v1532_v36, %v631_v62  ;;  %v672_v1 = vadd.f32 %v1532_v36, %v671_v63  ;;  %v554_v2 = vpop.f32.mrf.mxu0  ;;  %v594_v3 = vpop.f32.mrf.mxu1 }
  0xd1   : > { %v555_v4 = vadd.f32 %v1532_v36, %v554_v2  ;;  %v595_v5 = vadd.f32 %v1532_v36, %v594_v3 }
  0xd2   : > { %vm736_vm7 = vcmp.ge.f32.partialorder %v632_v0, 0.0  ;;  %v800_v6 = vmul.f32 0.2, %v632_v0  ;;  %vm752_vm8 = vcmp.ge.f32.partialorder %v672_v1, 0.0  ;;  %v816_v7 = vmul.f32 0.2, %v672_v1 }
  0xd3   : > { %vm705_vm9 = vcmp.ge.f32.partialorder %v555_v4, 0.0  ;;  %v769_v8 = vmul.f32 0.2, %v555_v4  ;;  %vm721_vm10 = vcmp.ge.f32.partialorder %v595_v5, 0.0  ;;  %v785_v9 = vmul.f32 0.2, %v595_v5 }
  0xd4   : > { %v864_v10 = vsel %vm736_vm7, %v632_v0, %v800_v6  ;;  %v880_v11 = vsel %vm752_vm8, %v672_v1, %v816_v7 }
  0xd5   : > { %928 = vst [vmem:[%s1538_s20 + $0x128] sm:$0xff] %v864_v10  ;;  %v833_v12 = vsel %vm705_vm9, %v555_v4, %v769_v8  ;;  %v849_v13 = vsel %vm721_vm10, %v595_v5, %v785_v9 }
  0xd6   : > { %944 = vst [vmem:[%s1538_s20 + $0x1a8] sm:$0xff] %v880_v11 }
  0xd7   : > { %897 = vst [vmem:[%s1538_s20 + $0x30] sm:$0xff] %v833_v12  ;;  %v634_v14 = vpop.f32.mrf.mxu2  ;;  %v674_v15 = vpop.f32.mrf.mxu3 }
  0xd8   : > { %913 = vst [vmem:[%s1538_s20 + $0xb0] sm:$0xff] %v849_v13  ;;  %v635_v16 = vadd.f32 %v1532_v36, %v634_v14  ;;  %v675_v17 = vadd.f32 %v1532_v36, %v674_v15  ;;  %v556_v18 = vpop.f32.mrf.mxu0  ;;  %v596_v19 = vpop.f32.mrf.mxu1 }
  0xd9   : > { %v557_v20 = vadd.f32 %v1532_v36, %v556_v18  ;;  %v597_v21 = vadd.f32 %v1532_v36, %v596_v19 }
  0xda   : > { %vm737_vm11 = vcmp.ge.f32.partialorder %v635_v16, 0.0  ;;  %v801_v22 = vmul.f32 0.2, %v635_v16  ;;  %vm753_vm12 = vcmp.ge.f32.partialorder %v675_v17, 0.0  ;;  %v817_v23 = vmul.f32 0.2, %v675_v17 }
  0xdb   : > { %vm706_vm13 = vcmp.ge.f32.partialorder %v557_v20, 0.0  ;;  %v770_v24 = vmul.f32 0.2, %v557_v20  ;;  %vm722_vm14 = vcmp.ge.f32.partialorder %v597_v21, 0.0  ;;  %v786_v25 = vmul.f32 0.2, %v597_v21 }
  0xdc   : > { %v865_v26 = vsel %vm737_vm11, %v635_v16, %v801_v22  ;;  %v881_v27 = vsel %vm753_vm12, %v675_v17, %v817_v23 }
  0xdd   : > { %929 = vst [vmem:[%s1538_s20 + $0x130] sm:$0xff] %v865_v26  ;;  %v834_v28 = vsel %vm706_vm13, %v557_v20, %v770_v24  ;;  %v850_v29 = vsel %vm722_vm14, %v597_v21, %v786_v25 }
  0xde   : > { %945 = vst [vmem:[%s1538_s20 + $0x1b0] sm:$0xff] %v881_v27 }
  0xdf   : > { %898 = vst [vmem:[%s1538_s20 + $0x38] sm:$0xff] %v834_v28  ;;  %v636_v30 = vpop.f32.mrf.mxu2  ;;  %v676_v31 = vpop.f32.mrf.mxu3 }
  0xe0   : > { %914 = vst [vmem:[%s1538_s20 + $0xb8] sm:$0xff] %v850_v29  ;;  %v637_v32 = vadd.f32 %v1532_v36, %v636_v30  ;;  %v677_v33 = vadd.f32 %v1532_v36, %v676_v31  ;;  %v559_v34 = vpop.f32.mrf.mxu0  ;;  %v599_v35 = vpop.f32.mrf.mxu1 }
  0xe1   : > { %v560_v37 = vadd.f32 %v1532_v36, %v559_v34  ;;  %v600_v38 = vadd.f32 %v1532_v36, %v599_v35 }
  0xe2   : > { %vm738_vm15 = vcmp.ge.f32.partialorder %v637_v32, 0.0  ;;  %v802_v39 = vmul.f32 0.2, %v637_v32  ;;  %vm754_vm0 = vcmp.ge.f32.partialorder %v677_v33, 0.0  ;;  %v818_v40 = vmul.f32 0.2, %v677_v33 }
  0xe3   : > { %vm707_vm1 = vcmp.ge.f32.partialorder %v560_v37, 0.0  ;;  %v771_v41 = vmul.f32 0.2, %v560_v37  ;;  %vm723_vm2 = vcmp.ge.f32.partialorder %v600_v38, 0.0  ;;  %v787_v42 = vmul.f32 0.2, %v600_v38 }
  0xe4   : > { %v866_v43 = vsel %vm738_vm15, %v637_v32, %v802_v39  ;;  %v882_v44 = vsel %vm754_vm0, %v677_v33, %v818_v40 }
  0xe5   : > { %930 = vst [vmem:[%s1538_s20 + $0x138] sm:$0xff] %v866_v43  ;;  %v835_v45 = vsel %vm707_vm1, %v560_v37, %v771_v41  ;;  %v851_v46 = vsel %vm723_vm2, %v600_v38, %v787_v42 }
  0xe6   : > { %946 = vst [vmem:[%s1538_s20 + $0x1b8] sm:$0xff] %v882_v44 }
  0xe7   : > { %899 = vst [vmem:[%s1538_s20 + $0x40] sm:$0xff] %v835_v45  ;;  %v639_v47 = vpop.f32.mrf.mxu2  ;;  %v679_v48 = vpop.f32.mrf.mxu3 }
  0xe8   : > { %915 = vst [vmem:[%s1538_s20 + $0xc0] sm:$0xff] %v851_v46  ;;  %v640_v49 = vadd.f32 %v1532_v36, %v639_v47  ;;  %v680_v50 = vadd.f32 %v1532_v36, %v679_v48  ;;  %v561_v51 = vpop.f32.mrf.mxu0  ;;  %v601_v52 = vpop.f32.mrf.mxu1 }
  0xe9   : > { %v562_v53 = vadd.f32 %v1532_v36, %v561_v51  ;;  %v602_v54 = vadd.f32 %v1532_v36, %v601_v52 }
  0xea   : > { %vm739_vm3 = vcmp.ge.f32.partialorder %v640_v49, 0.0  ;;  %v803_v55 = vmul.f32 0.2, %v640_v49  ;;  %vm755_vm4 = vcmp.ge.f32.partialorder %v680_v50, 0.0  ;;  %v819_v56 = vmul.f32 0.2, %v680_v50 }
  0xeb   : > { %vm708_vm5 = vcmp.ge.f32.partialorder %v562_v53, 0.0  ;;  %v772_v57 = vmul.f32 0.2, %v562_v53  ;;  %vm724_vm6 = vcmp.ge.f32.partialorder %v602_v54, 0.0  ;;  %v788_v58 = vmul.f32 0.2, %v602_v54 }
  0xec   : > { %v867_v59 = vsel %vm739_vm3, %v640_v49, %v803_v55  ;;  %v883_v60 = vsel %vm755_vm4, %v680_v50, %v819_v56 }
  0xed   : > { %931 = vst [vmem:[%s1538_s20 + $0x140] sm:$0xff] %v867_v59  ;;  %v836_v61 = vsel %vm708_vm5, %v562_v53, %v772_v57  ;;  %v852_v62 = vsel %vm724_vm6, %v602_v54, %v788_v58 }
  0xee   : > { %947 = vst [vmem:[%s1538_s20 + $0x1c0] sm:$0xff] %v883_v60 }
  0xef   : > { %900 = vst [vmem:[%s1538_s20 + $0x48] sm:$0xff] %v836_v61  ;;  %v641_v63 = vpop.f32.mrf.mxu2  ;;  %v681_v0 = vpop.f32.mrf.mxu3 }
  0xf0   : > { %916 = vst [vmem:[%s1538_s20 + $0xc8] sm:$0xff] %v852_v62  ;;  %v642_v1 = vadd.f32 %v1532_v36, %v641_v63  ;;  %v682_v2 = vadd.f32 %v1532_v36, %v681_v0  ;;  %v564_v3 = vpop.f32.mrf.mxu0  ;;  %v604_v4 = vpop.f32.mrf.mxu1 }
  0xf1   : > { %v565_v5 = vadd.f32 %v1532_v36, %v564_v3  ;;  %v605_v6 = vadd.f32 %v1532_v36, %v604_v4 }
  0xf2   : > { %vm740_vm7 = vcmp.ge.f32.partialorder %v642_v1, 0.0  ;;  %v804_v7 = vmul.f32 0.2, %v642_v1  ;;  %vm756_vm8 = vcmp.ge.f32.partialorder %v682_v2, 0.0  ;;  %v820_v8 = vmul.f32 0.2, %v682_v2 }
  0xf3   : > { %vm709_vm9 = vcmp.ge.f32.partialorder %v565_v5, 0.0  ;;  %v773_v9 = vmul.f32 0.2, %v565_v5  ;;  %vm725_vm10 = vcmp.ge.f32.partialorder %v605_v6, 0.0  ;;  %v789_v10 = vmul.f32 0.2, %v605_v6 }
  0xf4   : > { %v868_v11 = vsel %vm740_vm7, %v642_v1, %v804_v7  ;;  %v884_v12 = vsel %vm756_vm8, %v682_v2, %v820_v8 }
  0xf5   : > { %932 = vst [vmem:[%s1538_s20 + $0x148] sm:$0xff] %v868_v11  ;;  %v837_v13 = vsel %vm709_vm9, %v565_v5, %v773_v9  ;;  %v853_v14 = vsel %vm725_vm10, %v605_v6, %v789_v10 }
  0xf6   : > { %948 = vst [vmem:[%s1538_s20 + $0x1c8] sm:$0xff] %v884_v12 }
  0xf7   : > { %901 = vst [vmem:[%s1538_s20 + $0x50] sm:$0xff] %v837_v13  ;;  %v644_v15 = vpop.f32.mrf.mxu2  ;;  %v684_v16 = vpop.f32.mrf.mxu3 }
  0xf8   : > { %917 = vst [vmem:[%s1538_s20 + $0xd0] sm:$0xff] %v853_v14  ;;  %v645_v17 = vadd.f32 %v1532_v36, %v644_v15  ;;  %v685_v18 = vadd.f32 %v1532_v36, %v684_v16  ;;  %v566_v19 = vpop.f32.mrf.mxu0  ;;  %v606_v20 = vpop.f32.mrf.mxu1 }
  0xf9   : > { %v567_v21 = vadd.f32 %v1532_v36, %v566_v19  ;;  %v607_v22 = vadd.f32 %v1532_v36, %v606_v20 }
  0xfa   : > { %vm741_vm11 = vcmp.ge.f32.partialorder %v645_v17, 0.0  ;;  %v805_v23 = vmul.f32 0.2, %v645_v17  ;;  %vm757_vm12 = vcmp.ge.f32.partialorder %v685_v18, 0.0  ;;  %v821_v24 = vmul.f32 0.2, %v685_v18 }
  0xfb   : > { %vm710_vm13 = vcmp.ge.f32.partialorder %v567_v21, 0.0  ;;  %v774_v25 = vmul.f32 0.2, %v567_v21  ;;  %vm726_vm14 = vcmp.ge.f32.partialorder %v607_v22, 0.0  ;;  %v790_v26 = vmul.f32 0.2, %v607_v22 }
  0xfc   : > { %v869_v27 = vsel %vm741_vm11, %v645_v17, %v805_v23  ;;  %v885_v28 = vsel %vm757_vm12, %v685_v18, %v821_v24 }
  0xfd   : > { %933 = vst [vmem:[%s1538_s20 + $0x150] sm:$0xff] %v869_v27  ;;  %v838_v29 = vsel %vm710_vm13, %v567_v21, %v774_v25  ;;  %v854_v30 = vsel %vm726_vm14, %v607_v22, %v790_v26 }
  0xfe   : > { %949 = vst [vmem:[%s1538_s20 + $0x1d0] sm:$0xff] %v885_v28 }
  0xff   : > { %902 = vst [vmem:[%s1538_s20 + $0x58] sm:$0xff] %v838_v29  ;;  %v646_v31 = vpop.f32.mrf.mxu2  ;;  %v686_v32 = vpop.f32.mrf.mxu3 }
 0x100   : > { %918 = vst [vmem:[%s1538_s20 + $0xd8] sm:$0xff] %v854_v30  ;;  %v647_v33 = vadd.f32 %v1532_v36, %v646_v31  ;;  %v687_v34 = vadd.f32 %v1532_v36, %v686_v32  ;;  %v569_v35 = vpop.f32.mrf.mxu0  ;;  %v609_v37 = vpop.f32.mrf.mxu1 }
 0x101   : > { %v570_v38 = vadd.f32 %v1532_v36, %v569_v35  ;;  %v610_v39 = vadd.f32 %v1532_v36, %v609_v37 }
 0x102   : > { %vm742_vm15 = vcmp.ge.f32.partialorder %v647_v33, 0.0  ;;  %v806_v40 = vmul.f32 0.2, %v647_v33  ;;  %vm758_vm0 = vcmp.ge.f32.partialorder %v687_v34, 0.0  ;;  %v822_v41 = vmul.f32 0.2, %v687_v34 }
 0x103   : > { %vm711_vm1 = vcmp.ge.f32.partialorder %v570_v38, 0.0  ;;  %v775_v42 = vmul.f32 0.2, %v570_v38  ;;  %vm727_vm2 = vcmp.ge.f32.partialorder %v610_v39, 0.0  ;;  %v791_v43 = vmul.f32 0.2, %v610_v39 }
 0x104   : > { %v870_v44 = vsel %vm742_vm15, %v647_v33, %v806_v40  ;;  %v886_v45 = vsel %vm758_vm0, %v687_v34, %v822_v41 }
 0x105   : > { %934 = vst [vmem:[%s1538_s20 + $0x158] sm:$0xff] %v870_v44  ;;  %v839_v46 = vsel %vm711_vm1, %v570_v38, %v775_v42  ;;  %v855_v47 = vsel %vm727_vm2, %v610_v39, %v791_v43 }
 0x106   : > { %950 = vst [vmem:[%s1538_s20 + $0x1d8] sm:$0xff] %v886_v45 }
 0x107   : > { %903 = vst [vmem:[%s1538_s20 + $0x60] sm:$0xff] %v839_v46  ;;  %v649_v48 = vpop.f32.mrf.mxu2  ;;  %v689_v49 = vpop.f32.mrf.mxu3 }
 0x108   : > { %919 = vst [vmem:[%s1538_s20 + $0xe0] sm:$0xff] %v855_v47  ;;  %v650_v50 = vadd.f32 %v1532_v36, %v649_v48  ;;  %v690_v51 = vadd.f32 %v1532_v36, %v689_v49  ;;  %v571_v52 = vpop.f32.mrf.mxu0  ;;  %v611_v53 = vpop.f32.mrf.mxu1 }
 0x109   : > { %v572_v54 = vadd.f32 %v1532_v36, %v571_v52  ;;  %v612_v55 = vadd.f32 %v1532_v36, %v611_v53 }
 0x10a   : > { %vm743_vm3 = vcmp.ge.f32.partialorder %v650_v50, 0.0  ;;  %v807_v56 = vmul.f32 0.2, %v650_v50  ;;  %vm759_vm4 = vcmp.ge.f32.partialorder %v690_v51, 0.0  ;;  %v823_v57 = vmul.f32 0.2, %v690_v51 }
 0x10b   : > { %vm712_vm5 = vcmp.ge.f32.partialorder %v572_v54, 0.0  ;;  %v776_v58 = vmul.f32 0.2, %v572_v54  ;;  %vm728_vm6 = vcmp.ge.f32.partialorder %v612_v55, 0.0  ;;  %v792_v59 = vmul.f32 0.2, %v612_v55 }
 0x10c   : > { %v871_v60 = vsel %vm743_vm3, %v650_v50, %v807_v56  ;;  %v887_v61 = vsel %vm759_vm4, %v690_v51, %v823_v57 }
 0x10d   : > { %935 = vst [vmem:[%s1538_s20 + $0x160] sm:$0xff] %v871_v60  ;;  %v840_v62 = vsel %vm712_vm5, %v572_v54, %v776_v58  ;;  %v856_v63 = vsel %vm728_vm6, %v612_v55, %v792_v59 }
 0x10e   : > { %951 = vst [vmem:[%s1538_s20 + $0x1e0] sm:$0xff] %v887_v61 }
 0x10f   : > { %904 = vst [vmem:[%s1538_s20 + $0x68] sm:$0xff] %v840_v62  ;;  %v651_v0 = vpop.f32.mrf.mxu2  ;;  %v691_v1 = vpop.f32.mrf.mxu3 }
 0x110   : > { %920 = vst [vmem:[%s1538_s20 + $0xe8] sm:$0xff] %v856_v63  ;;  %v652_v2 = vadd.f32 %v1532_v36, %v651_v0  ;;  %v692_v3 = vadd.f32 %v1532_v36, %v691_v1  ;;  %v574_v4 = vpop.f32.mrf.mxu0  ;;  %v614_v5 = vpop.f32.mrf.mxu1 }
 0x111   : > { %v575_v6 = vadd.f32 %v1532_v36, %v574_v4  ;;  %v615_v7 = vadd.f32 %v1532_v36, %v614_v5 }
 0x112   : > { %vm744_vm7 = vcmp.ge.f32.partialorder %v652_v2, 0.0  ;;  %v808_v8 = vmul.f32 0.2, %v652_v2  ;;  %vm760_vm8 = vcmp.ge.f32.partialorder %v692_v3, 0.0  ;;  %v824_v9 = vmul.f32 0.2, %v692_v3 }
 0x113   : > { %vm713_vm9 = vcmp.ge.f32.partialorder %v575_v6, 0.0  ;;  %v777_v10 = vmul.f32 0.2, %v575_v6  ;;  %vm729_vm10 = vcmp.ge.f32.partialorder %v615_v7, 0.0  ;;  %v793_v11 = vmul.f32 0.2, %v615_v7 }
 0x114   : > { %v872_v12 = vsel %vm744_vm7, %v652_v2, %v808_v8  ;;  %v888_v13 = vsel %vm760_vm8, %v692_v3, %v824_v9 }
 0x115   : > { %936 = vst [vmem:[%s1538_s20 + $0x168] sm:$0xff] %v872_v12  ;;  %v841_v14 = vsel %vm713_vm9, %v575_v6, %v777_v10  ;;  %v857_v15 = vsel %vm729_vm10, %v615_v7, %v793_v11 }
 0x116   : > { %952 = vst [vmem:[%s1538_s20 + $0x1e8] sm:$0xff] %v888_v13 }
 0x117   : > { %905 = vst [vmem:[%s1538_s20 + $0x70] sm:$0xff] %v841_v14  ;;  %v654_v16 = vpop.f32.mrf.mxu2  ;;  %v694_v17 = vpop.f32.mrf.mxu3 }
 0x118   : > { %921 = vst [vmem:[%s1538_s20 + $0xf0] sm:$0xff] %v857_v15  ;;  %v655_v18 = vadd.f32 %v1532_v36, %v654_v16  ;;  %v695_v19 = vadd.f32 %v1532_v36, %v694_v17  ;;  %v576_v20 = vpop.f32.mrf.mxu0  ;;  %v616_v21 = vpop.f32.mrf.mxu1 }
 0x119   : > { %v577_v22 = vadd.f32 %v1532_v36, %v576_v20  ;;  %v617_v23 = vadd.f32 %v1532_v36, %v616_v21 }
 0x11a   : > { %vm745_vm11 = vcmp.ge.f32.partialorder %v655_v18, 0.0  ;;  %v809_v24 = vmul.f32 0.2, %v655_v18  ;;  %vm761_vm12 = vcmp.ge.f32.partialorder %v695_v19, 0.0  ;;  %v825_v25 = vmul.f32 0.2, %v695_v19 }
 0x11b   : > { %vm714_vm13 = vcmp.ge.f32.partialorder %v577_v22, 0.0  ;;  %v778_v26 = vmul.f32 0.2, %v577_v22  ;;  %vm730_vm14 = vcmp.ge.f32.partialorder %v617_v23, 0.0  ;;  %v794_v27 = vmul.f32 0.2, %v617_v23 }
 0x11c   : > { %v873_v28 = vsel %vm745_vm11, %v655_v18, %v809_v24  ;;  %v889_v29 = vsel %vm761_vm12, %v695_v19, %v825_v25 }
 0x11d   : > { %937 = vst [vmem:[%s1538_s20 + $0x170] sm:$0xff] %v873_v28  ;;  %v842_v30 = vsel %vm714_vm13, %v577_v22, %v778_v26  ;;  %v858_v31 = vsel %vm730_vm14, %v617_v23, %v794_v27 }
 0x11e   : > { %953 = vst [vmem:[%s1538_s20 + $0x1f0] sm:$0xff] %v889_v29 }
 0x11f   : > { %906 = vst [vmem:[%s1538_s20 + $0x78] sm:$0xff] %v842_v30  ;;  %v656_v32 = vpop.f32.mrf.mxu2  ;;  %v696_v33 = vpop.f32.mrf.mxu3 }
 0x120   : > { %922 = vst [vmem:[%s1538_s20 + $0xf8] sm:$0xff] %v858_v31  ;;  %v657_v34 = vadd.f32 %v1532_v36, %v656_v32  ;;  %v697_v35 = vadd.f32 %v1532_v36, %v696_v33 }
 0x122   : > { %vm746_vm15 = vcmp.ge.f32.partialorder %v657_v34, 0.0  ;;  %v810_v37 = vmul.f32 0.2, %v657_v34  ;;  %vm762_vm0 = vcmp.ge.f32.partialorder %v697_v35, 0.0  ;;  %v826_v38 = vmul.f32 0.2, %v697_v35 }
 0x124   : > { %v874_v39 = vsel %vm746_vm15, %v657_v34, %v810_v37  ;;  %v890_v40 = vsel %vm762_vm0, %v697_v35, %v826_v38 }
 0x125   : > { %938 = vst [vmem:[%s1538_s20 + $0x178] sm:$0xff] %v874_v39 }
 0x126   : > { %954 = vst [vmem:[%s1538_s20 + $0x1f8] sm:$0xff] %v890_v40 }
 0x127   : > { %1339 = shalt.err (!%p1336_p3)
}
 0x128   : > { %s1376_s10 = smov 128   ;;  %s1377_s11 = smov 8  }
 0x129   : > { %1270 = dma.vmem_to_hbm [thread:$0]  (%p1436_p5), %s969_s27, 8192, %s971_s28, %s956_s29, %s1376_s10, %s1376_s10, %s1377_s11  }
 0x12a PF: > { %p1276_p4 = scmp.ge.s32.totalorder %s1374_s15, 2  ;;  %s985_s17 = sand.u32 1, %s1362_s12  }
 0x12b   : > { %s986_s19 = scalar_lea.sflag [#allocation3], %s985_s17 }
 0x12c   : > { %p1273_p7 = pnand %p1276_p4, %p1440_p6 }
 0x12e   : > { %p1274_p8 = pneg %p1273_p7 }
 0x130   : > { %1357 = dma.done.wait (%p1274_p8), %s986_s19, 8192  }
 0x131   : > { %1359 = vsyncadd (%p1274_p8), %s986_s19, 4294959104  ;;  %p13_p9 = scmp.ge.s32.totalorder %s1423_s18, 4   ;;  %s1706_s12 = smov %s1366_s13 }
 0x132   : > { %s1707_s13 = smov %s1370_s14  ;;  %s1708_s14 = smov %s1434_s21 }
 0x133   : > { %s1709_s15 = smov %s1423_s18  ;;  %15 = sbr.rel (!%p13_p9) target bundleno = 3 (0x3), region = 67 }
 0x138   :  { %992 = vsyncpa [#allocation3], 1 }
 0x139   :  { %994 = vsyncpa [#allocation3 + $0x1], 1 }

</bundles_post_ra>
